<compile_context>
chip_gen: v7x
topology: tpu7x:2x2x1
jax: 0.10.0
libtpu: 0.0.40
codegen_flags: <defaults>
</compile_context>

<pallas_src>
import functools

import jax
import jax.numpy as jnp
from jax.experimental import pallas as pl
from jax.experimental.pallas import tpu as pltpu

_LANE = 128


def _round_up(x, m):
    return ((x + m - 1) // m) * m


def _round_down(x, m):
    return (x // m) * m


# ---------------------------------------------------------------------------
# Kernel
# ---------------------------------------------------------------------------
def _critic_kernel(s_ref, a_ref, w1_ref, b1_ref, w2a_ref, w2b_ref, b2_ref,
                   w3_ref, b3_ref, out_ref, *, log):
    mxu = w1_ref.dtype                      # bf16 MXU operands, f32 accumulate
    s = s_ref[...].astype(mxu)              # cast in-kernel: no extra HBM pass
    a = a_ref[...].astype(mxu)

    # fc1 + relu
    h1 = jnp.dot(s, w1_ref[...], preferred_element_type=jnp.float32)
    h1 = jnp.maximum(h1 + b1_ref[...], 0.0)

    # fc2 over concat([h1, actions]) == h1 @ W2a + actions @ W2b
    h2 = (jnp.dot(h1.astype(mxu), w2a_ref[...],
                  preferred_element_type=jnp.float32)
          + jnp.dot(a, w2b_ref[...], preferred_element_type=jnp.float32)
          + b2_ref[...])
    h2 = jnp.maximum(h2, 0.0)

    # fc3: padded logit lanes carry a -1e30 f32 bias so softmax ignores them.
    logits = jnp.dot(h2.astype(mxu), w3_ref[...],
                     preferred_element_type=jnp.float32) + b3_ref[...]

    # (log-)softmax over the last dim, all f32 (v5e-safe).  Exact divide:
    # downstream code may be distribution-sensitive (rows must sum to 1).
    m = jnp.max(logits, axis=-1, keepdims=True)
    z = logits - m
    e = jnp.exp(z)
    denom = jnp.sum(e, axis=-1, keepdims=True)
    if log:
        out = z - jnp.log(denom)
    else:
        out = e / denom
    out_ref[...] = out.astype(out_ref.dtype)


# ---------------------------------------------------------------------------
# Tile / VMEM sizing
# ---------------------------------------------------------------------------
def _tpu_caps():
    """(vmem_capacity_bytes, tensorcores_per_chip) with conservative fallbacks."""
    vmem = 64 << 20          # v7x per-TC VMEM is the smallest across v5e/v6e/v7x
    cores = 1
    try:
        info = pltpu.get_tpu_info()
        vmem = int(getattr(info, "vmem_capacity_bytes", vmem))
        for attr in ("num_cores", "tensor_cores_per_chip", "num_tensorcores",
                     "cores_per_chip"):
            v = getattr(info, attr, None)
            if v:
                cores = int(v)
                break
    except Exception:
        pass
    try:
        cores = max(cores, int(getattr(jax.devices()[0], "num_cores", 1)))
    except Exception:
        pass
    return vmem, max(1, min(cores, 2))


def _choose_batch_tile(batch, bytes_per_row, *, tile_budget_bytes,
                       num_tensorcores):
    """Largest 16-aligned batch tile that fits the VMEM budget.

    v5e/v6e (single TC): fewer grid steps is strictly better (~0.35us fixed
    cost per step), so take the whole 16-aligned batch when it fits -- the
    compiler splits M for the MXU internally, no 128/256-row cap needed.
    v7x (2 TCs): split so the "parallel" batch axis has one step per core.
    """
    b16 = _round_up(batch, 16)              # bf16 vreg packing is [16, 128]
    cap = _round_down(max(tile_budget_bytes // max(bytes_per_row, 1), 16), 16)
    cap = max(16, min(cap, 1024))
    if num_tensorcores >= 2 and b16 >= 2 * 16:
        b16 = _round_up(pl.cdiv(b16, num_tensorcores), 16)
    return min(b16, cap)


# ---------------------------------------------------------------------------
# Wrapper
# ---------------------------------------------------------------------------
def critic_forward(states, actions, params, *, log=False, return_padded=False):
    """states: [B, S] f32, actions: [B, A] f32 -> [B, num_atoms] f32.

    If return_padded=True, the lane-padded [B, Np] kernel output is returned
    directly (padded softmax lanes are exactly 0; log-softmax lanes are huge
    negatives), letting a downstream consumer skip the slice's HBM pass.
    """
    w1, b1 = params["w1"], params["b1"]
    w2a, w2b, b2 = params["w2a"], params["w2b"], params["b2"]
    w3, b3 = params["w3"], params["b3"]
    num_atoms = params["num_atoms"]

    B, S = states.shape
    A = actions.shape[1]
    Np = w3.shape[1]

    weights = (w1, b1, w2a, w2b, b2, w3, b3)
    weight_bytes = sum(int(w.size) * w.dtype.itemsize for w in weights)

    vmem_cap, n_cores = _tpu_caps()
    # f32 states/actions tiles + f32 output tile, each double-buffered.
    bytes_per_row = 2 * 4 * (S + A) + 2 * 4 * Np
    headroom = 4 << 20
    tile_budget = max(2 << 20,
                      min(vmem_cap, 64 << 20) - 2 * weight_bytes - headroom)
    batch_tile = _choose_batch_tile(B, bytes_per_row,
                                    tile_budget_bytes=tile_budget,
                                    num_tensorcores=n_cores)
    vmem_limit = int(min(vmem_cap,
                         max(16 << 20,
                             2 * weight_bytes + batch_tile * bytes_per_row
                             + headroom)))

    grid = (pl.cdiv(B, batch_tile),)   # partial last block handled by Pallas
    args = (states.astype(jnp.float32), actions.astype(jnp.float32)) + weights

    def run(weight_buffers):
        # Grid-invariant weight/bias blocks: single-buffer when supported.
        def full(arr):
            kwargs = {}
            if weight_buffers is not None:
                kwargs["pipeline_mode"] = pl.Buffered(weight_buffers)
            return pl.BlockSpec(arr.shape, lambda i: (0, 0), **kwargs)

        return pl.pallas_call(
            functools.partial(_critic_kernel, log=log),
            out_shape=jax.ShapeDtypeStruct((B, Np), jnp.float32),
            grid=grid,
            in_specs=[
                pl.BlockSpec((batch_tile, S), lambda i: (i, 0)),   # states
                pl.BlockSpec((batch_tile, A), lambda i: (i, 0)),   # actions
                full(w1), full(b1),
                full(w2a), full(w2b), full(b2),
                full(w3), full(b3),
            ],
            out_specs=pl.BlockSpec((batch_tile, Np), lambda i: (i, 0)),
            # TODO(synk): on v7x verify the batch axis actually shards across
            # both TensorCores; switch to pltpu.CORE_PARALLEL / core_map if
            # plain "parallel" does not.
            compiler_params=pltpu.CompilerParams(
                dimension_semantics=("parallel",),
                vmem_limit_bytes=vmem_limit),
        )(*args)

    try:
        out = run(1)            # single-buffer the grid-invariant weights
    except Exception:
        out = run(None)         # fallback: default (double) buffering

    if return_padded:
        return out
    return out[:, :num_atoms]   # lane padding only; no batch rows to strip


# ---------------------------------------------------------------------------
# Parameter init (matches initialize_weights: uniform(-0.03, 0.03))
# ---------------------------------------------------------------------------
def init_critic_params(key, actions_size, states_size, hidden_in_size,
                       hidden_out_size, num_atoms, low=-0.03, high=0.03,
                       weight_dtype=jnp.bfloat16):
    """Weights are stored pre-transposed [in, out], zero-padded to 128-lane
    multiples and cast to `weight_dtype` for the MXU.  Biases stay f32 (the
    -1e30 padded-logit bias must not become bf16 -inf).  Returns
    (padded_params, raw_f32).

    Note: for v6e/v7x deployments with configurable sizes, hidden/atom widths
    that are multiples of 256 fill the 256-wide MXU; 128 is right for v5e.
    """
    ks = jax.random.split(key, 6)
    u = lambda k, shape: jax.random.uniform(k, shape, jnp.float32, low, high)

    w1 = u(ks[0], (states_size, hidden_in_size))
    b1 = u(ks[1], (hidden_in_size,))
    w2 = u(ks[2], (hidden_in_size + actions_size, hidden_out_size))
    b2 = u(ks[3], (hidden_out_size,))
    w3 = u(ks[4], (hidden_out_size, num_atoms))
    b3 = u(ks[5], (num_atoms,))

    h1p = _round_up(hidden_in_size, _LANE)
    h2p = _round_up(hidden_out_size, _LANE)
    npad = _round_up(num_atoms, _LANE)

    def pad2(arr, rows, cols):
        return jnp.pad(arr, ((0, rows - arr.shape[0]),
                             (0, cols - arr.shape[1])))

    # Split W2 into the h1 block and the actions block (concat equivalence).
    w2a = w2[:hidden_in_size]
    w2b = w2[hidden_in_size:]

    params = dict(
        w1=pad2(w1, states_size, h1p).astype(weight_dtype),
        b1=jnp.pad(b1, (0, h1p - hidden_in_size)).reshape(1, h1p),
        w2a=pad2(w2a, h1p, h2p).astype(weight_dtype),
        w2b=pad2(w2b, actions_size, h2p).astype(weight_dtype),
        b2=jnp.pad(b2, (0, h2p - hidden_out_size)).reshape(1, h2p),
        w3=pad2(w3, h2p, npad).astype(weight_dtype),
        # Padded logit lanes get -1e30 (f32!) so softmax assigns them zero.
        b3=jnp.pad(b3, (0, npad - num_atoms),
                   constant_values=-1e30).reshape(1, npad),
        num_atoms=num_atoms,
    )
    raw = (w1, b1, w2, b2, w3, b3)
    return params, raw


def _reference(states, actions, raw_params, log=False):
    w1, b1, w2, b2, w3, b3 = raw_params
    h1 = jax.nn.relu(states @ w1 + b1)
    h1_cat = jnp.concatenate([h1, actions], axis=1)
    h2 = jax.nn.relu(h1_cat @ w2 + b2)
    logits = h2 @ w3 + b3
    return (jax.nn.log_softmax(logits, axis=-1) if log
            else jax.nn.softmax(logits, axis=-1))


if __name__ == "__main__":
    # Small shapes consistent with the module's forward pass.
    batch = 16
    states_size = 32
    actions_size = 16
    hidden_in_size = 64
    hidden_out_size = 64
    num_atoms = 16

    key = jax.random.PRNGKey(0)
    k_params, k_s, k_a = jax.random.split(key, 3)

    params, raw = init_critic_params(
        k_params, actions_size, states_size, hidden_in_size,
        hidden_out_size, num_atoms)

    states = jax.random.normal(k_s, (batch, states_size), jnp.float32)
    actions = jax.random.normal(k_a, (batch, actions_size), jnp.float32)

    # softmax path
    out = jax.block_until_ready(critic_forward(states, actions, params,
                                               log=False))
    ref = _reference(states, actions, raw, log=False)
    assert out.shape == (batch, num_atoms)
    assert jnp.allclose(out, ref, atol=2e-3, rtol=2e-3), \
        float(jnp.max(jnp.abs(out - ref)))

    # log_softmax path
    out_log = jax.block_until_ready(critic_forward(states, actions, params,
                                                   log=True))
    ref_log = _reference(states, actions, raw, log=True)
    assert jnp.allclose(out_log, ref_log, atol=5e-3, rtol=5e-3), \
        float(jnp.max(jnp.abs(out_log - ref_log)))

    print("KERNEL_OK")
</pallas_src>

<mosaic_0001>
module attributes {stable_mosaic.version = 11 : i64} {
  func.func @_critic_kernel(%arg0: i32, %arg1: memref<16x32xf32, #tpu.memory_space<vmem>>, %arg2: memref<16x16xf32, #tpu.memory_space<vmem>>, %arg3: memref<32x128xbf16, #tpu.memory_space<vmem>>, %arg4: memref<1x128xf32, #tpu.memory_space<vmem>>, %arg5: memref<128x128xbf16, #tpu.memory_space<vmem>>, %arg6: memref<16x128xbf16, #tpu.memory_space<vmem>>, %arg7: memref<1x128xf32, #tpu.memory_space<vmem>>, %arg8: memref<128x128xbf16, #tpu.memory_space<vmem>>, %arg9: memref<1x128xf32, #tpu.memory_space<vmem>>, %arg10: memref<16x128xf32, #tpu.memory_space<vmem>>) attributes {dimension_semantics = [#tpu.dimension_semantics<parallel>], iteration_bounds = array<i64: 1>, scalar_prefetch = 0 : i64, scratch_operands = 0 : i64, tpu.core_type = #tpu.core_type<tc>, window_params = [{transform_indices = @transform_0, window_bounds = array<i64: 16, 32>}, {transform_indices = @transform_1, window_bounds = array<i64: 16, 16>}, {pipeline_mode = #tpu.pipeline_mode<synchronous>, transform_indices = @transform_2, window_bounds = array<i64: 32, 128>}, {pipeline_mode = #tpu.pipeline_mode<synchronous>, transform_indices = @transform_3, window_bounds = array<i64: 1, 128>}, {pipeline_mode = #tpu.pipeline_mode<synchronous>, transform_indices = @transform_4, window_bounds = array<i64: 128, 128>}, {pipeline_mode = #tpu.pipeline_mode<synchronous>, transform_indices = @transform_5, window_bounds = array<i64: 16, 128>}, {pipeline_mode = #tpu.pipeline_mode<synchronous>, transform_indices = @transform_6, window_bounds = array<i64: 1, 128>}, {pipeline_mode = #tpu.pipeline_mode<synchronous>, transform_indices = @transform_7, window_bounds = array<i64: 128, 128>}, {pipeline_mode = #tpu.pipeline_mode<synchronous>, transform_indices = @transform_8, window_bounds = array<i64: 1, 128>}, {transform_indices = @transform_9, window_bounds = array<i64: 16, 128>}]} {
    %c0 = arith.constant 0 : index
    %c0_0 = arith.constant 0 : index
    %0 = vector.load %arg1[%c0, %c0_0] : memref<16x32xf32, #tpu.memory_space<vmem>>, vector<16x32xf32>
    %1 = arith.truncf %0 : vector<16x32xf32> to vector<16x32xbf16>
    %c0_1 = arith.constant 0 : index
    %c0_2 = arith.constant 0 : index
    %2 = vector.load %arg2[%c0_1, %c0_2] : memref<16x16xf32, #tpu.memory_space<vmem>>, vector<16x16xf32>
    %3 = arith.truncf %2 : vector<16x16xf32> to vector<16x16xbf16>
    %c0_3 = arith.constant 0 : index
    %c0_4 = arith.constant 0 : index
    %4 = vector.load %arg3[%c0_3, %c0_4] : memref<32x128xbf16, #tpu.memory_space<vmem>>, vector<32x128xbf16>
    %cst = arith.constant dense<0.000000e+00> : vector<16x128xf32>
    %5 = tpu.matmul %1, %4, %cst {dimension_numbers = #tpu.dot_dimension_numbers<[1], [0], [0], [1], [0, 0, 1, 1], [], []>} : vector<16x32xbf16>, vector<32x128xbf16>, vector<16x128xf32> -> vector<16x128xf32>
    %c0_5 = arith.constant 0 : index
    %c0_6 = arith.constant 0 : index
    %6 = vector.load %arg4[%c0_5, %c0_6] : memref<1x128xf32, #tpu.memory_space<vmem>>, vector<1x128xf32>
    %7 = vector.broadcast %6 : vector<1x128xf32> to vector<16x128xf32>
    %8 = arith.addf %5, %7 : vector<16x128xf32>
    %cst_7 = arith.constant 0.000000e+00 : f32
    %9 = vector.broadcast %cst_7 : f32 to vector<16x128xf32>
    %10 = arith.maximumf %8, %9 : vector<16x128xf32>
    %11 = arith.truncf %10 : vector<16x128xf32> to vector<16x128xbf16>
    %c0_8 = arith.constant 0 : index
    %c0_9 = arith.constant 0 : index
    %12 = vector.load %arg5[%c0_8, %c0_9] : memref<128x128xbf16, #tpu.memory_space<vmem>>, vector<128x128xbf16>
    %cst_10 = arith.constant dense<0.000000e+00> : vector<16x128xf32>
    %13 = tpu.matmul %11, %12, %cst_10 {dimension_numbers = #tpu.dot_dimension_numbers<[1], [0], [0], [1], [0, 0, 1, 1], [], []>} : vector<16x128xbf16>, vector<128x128xbf16>, vector<16x128xf32> -> vector<16x128xf32>
    %c0_11 = arith.constant 0 : index
    %c0_12 = arith.constant 0 : index
    %14 = vector.load %arg6[%c0_11, %c0_12] : memref<16x128xbf16, #tpu.memory_space<vmem>>, vector<16x128xbf16>
    %cst_13 = arith.constant dense<0.000000e+00> : vector<16x128xf32>
    %15 = tpu.matmul %3, %14, %cst_13 {dimension_numbers = #tpu.dot_dimension_numbers<[1], [0], [0], [1], [0, 0, 1, 1], [], []>} : vector<16x16xbf16>, vector<16x128xbf16>, vector<16x128xf32> -> vector<16x128xf32>
    %16 = arith.addf %13, %15 : vector<16x128xf32>
    %c0_14 = arith.constant 0 : index
    %c0_15 = arith.constant 0 : index
    %17 = vector.load %arg7[%c0_14, %c0_15] : memref<1x128xf32, #tpu.memory_space<vmem>>, vector<1x128xf32>
    %18 = vector.broadcast %17 : vector<1x128xf32> to vector<16x128xf32>
    %19 = arith.addf %16, %18 : vector<16x128xf32>
    %cst_16 = arith.constant 0.000000e+00 : f32
    %20 = vector.broadcast %cst_16 : f32 to vector<16x128xf32>
    %21 = arith.maximumf %19, %20 : vector<16x128xf32>
    %22 = arith.truncf %21 : vector<16x128xf32> to vector<16x128xbf16>
    %c0_17 = arith.constant 0 : index
    %c0_18 = arith.constant 0 : index
    %23 = vector.load %arg8[%c0_17, %c0_18] : memref<128x128xbf16, #tpu.memory_space<vmem>>, vector<128x128xbf16>
    %cst_19 = arith.constant dense<0.000000e+00> : vector<16x128xf32>
    %24 = tpu.matmul %22, %23, %cst_19 {dimension_numbers = #tpu.dot_dimension_numbers<[1], [0], [0], [1], [0, 0, 1, 1], [], []>} : vector<16x128xbf16>, vector<128x128xbf16>, vector<16x128xf32> -> vector<16x128xf32>
    %c0_20 = arith.constant 0 : index
    %c0_21 = arith.constant 0 : index
    %25 = vector.load %arg9[%c0_20, %c0_21] : memref<1x128xf32, #tpu.memory_space<vmem>>, vector<1x128xf32>
    %26 = vector.broadcast %25 : vector<1x128xf32> to vector<16x128xf32>
    %27 = arith.addf %24, %26 : vector<16x128xf32>
    %cst_22 = arith.constant dense<0xFF800000> : vector<16xf32>
    %28 = vector.multi_reduction <maximumf>, %27, %cst_22 [1] : vector<16x128xf32> to vector<16xf32>
    %29 = vector.shape_cast %28 : vector<16xf32> to vector<16x1xf32>
    %30 = vector.broadcast %29 : vector<16x1xf32> to vector<16x128xf32>
    %31 = arith.subf %27, %30 : vector<16x128xf32>
    %32 = math.exp %31 : vector<16x128xf32>
    %cst_23 = arith.constant dense<0.000000e+00> : vector<16xf32>
    %33 = vector.multi_reduction <add>, %32, %cst_23 [1] : vector<16x128xf32> to vector<16xf32>
    %34 = vector.shape_cast %33 : vector<16xf32> to vector<16x1xf32>
    %35 = vector.broadcast %34 : vector<16x1xf32> to vector<16x128xf32>
    %36 = arith.divf %32, %35 : vector<16x128xf32>
    %c0_24 = arith.constant 0 : index
    %c0_25 = arith.constant 0 : index
    %37 = vector.load %arg10[%c0_24, %c0_25] : memref<16x128xf32, #tpu.memory_space<vmem>>, vector<16x128xf32>
    tpu.vector_store %arg10[%c0_24, %c0_25], %36 {strides = array<i32>} : memref<16x128xf32, #tpu.memory_space<vmem>>, vector<16x128xf32>,
    return
  }
  func.func @transform_0(%arg0: i32) -> (i32, i32) {
    %c0_i32 = arith.constant 0 : i32
    %c0_i32_0 = arith.constant 0 : i32
    return %arg0, %c0_i32 : i32, i32
  }
  func.func @transform_1(%arg0: i32) -> (i32, i32) {
    %c0_i32 = arith.constant 0 : i32
    %c0_i32_0 = arith.constant 0 : i32
    return %arg0, %c0_i32 : i32, i32
  }
  func.func @transform_2(%arg0: i32) -> (i32, i32) {
    %c0_i32 = arith.constant 0 : i32
    %c0_i32_0 = arith.constant 0 : i32
    %c0_i32_1 = arith.constant 0 : i32
    return %c0_i32, %c0_i32_0 : i32, i32
  }
  func.func @transform_3(%arg0: i32) -> (i32, i32) {
    %c0_i32 = arith.constant 0 : i32
    %c0_i32_0 = arith.constant 0 : i32
    %c0_i32_1 = arith.constant 0 : i32
    return %c0_i32, %c0_i32_0 : i32, i32
  }
  func.func @transform_4(%arg0: i32) -> (i32, i32) {
    %c0_i32 = arith.constant 0 : i32
    %c0_i32_0 = arith.constant 0 : i32
    %c0_i32_1 = arith.constant 0 : i32
    return %c0_i32, %c0_i32_0 : i32, i32
  }
  func.func @transform_5(%arg0: i32) -> (i32, i32) {
    %c0_i32 = arith.constant 0 : i32
    %c0_i32_0 = arith.constant 0 : i32
    %c0_i32_1 = arith.constant 0 : i32
    return %c0_i32, %c0_i32_0 : i32, i32
  }
  func.func @transform_6(%arg0: i32) -> (i32, i32) {
    %c0_i32 = arith.constant 0 : i32
    %c0_i32_0 = arith.constant 0 : i32
    %c0_i32_1 = arith.constant 0 : i32
    return %c0_i32, %c0_i32_0 : i32, i32
  }
  func.func @transform_7(%arg0: i32) -> (i32, i32) {
    %c0_i32 = arith.constant 0 : i32
    %c0_i32_0 = arith.constant 0 : i32
    %c0_i32_1 = arith.constant 0 : i32
    return %c0_i32, %c0_i32_0 : i32, i32
  }
  func.func @transform_8(%arg0: i32) -> (i32, i32) {
    %c0_i32 = arith.constant 0 : i32
    %c0_i32_0 = arith.constant 0 : i32
    %c0_i32_1 = arith.constant 0 : i32
    return %c0_i32, %c0_i32_0 : i32, i32
  }
  func.func @transform_9(%arg0: i32) -> (i32, i32) {
    %c0_i32 = arith.constant 0 : i32
    %c0_i32_0 = arith.constant 0 : i32
    return %arg0, %c0_i32 : i32, i32
  }
}

module attributes {stable_mosaic.version = 11 : i64} {
  func.func @_critic_kernel(%arg0: i32, %arg1: memref<16x32xf32, #tpu.memory_space<vmem>>, %arg2: memref<16x16xf32, #tpu.memory_space<vmem>>, %arg3: memref<32x128xbf16, #tpu.memory_space<vmem>>, %arg4: memref<1x128xf32, #tpu.memory_space<vmem>>, %arg5: memref<128x128xbf16, #tpu.memory_space<vmem>>, %arg6: memref<16x128xbf16, #tpu.memory_space<vmem>>, %arg7: memref<1x128xf32, #tpu.memory_space<vmem>>, %arg8: memref<128x128xbf16, #tpu.memory_space<vmem>>, %arg9: memref<1x128xf32, #tpu.memory_space<vmem>>, %arg10: memref<16x128xf32, #tpu.memory_space<vmem>>) attributes {dimension_semantics = [#tpu.dimension_semantics<parallel>], iteration_bounds = array<i64: 1>, scalar_prefetch = 0 : i64, scratch_operands = 0 : i64, tpu.core_type = #tpu.core_type<tc>, window_params = [{transform_indices = @transform_0, window_bounds = array<i64: 16, 32>}, {transform_indices = @transform_1, window_bounds = array<i64: 16, 16>}, {pipeline_mode = #tpu.pipeline_mode<synchronous>, transform_indices = @transform_2, window_bounds = array<i64: 32, 128>}, {pipeline_mode = #tpu.pipeline_mode<synchronous>, transform_indices = @transform_3, window_bounds = array<i64: 1, 128>}, {pipeline_mode = #tpu.pipeline_mode<synchronous>, transform_indices = @transform_4, window_bounds = array<i64: 128, 128>}, {pipeline_mode = #tpu.pipeline_mode<synchronous>, transform_indices = @transform_5, window_bounds = array<i64: 16, 128>}, {pipeline_mode = #tpu.pipeline_mode<synchronous>, transform_indices = @transform_6, window_bounds = array<i64: 1, 128>}, {pipeline_mode = #tpu.pipeline_mode<synchronous>, transform_indices = @transform_7, window_bounds = array<i64: 128, 128>}, {pipeline_mode = #tpu.pipeline_mode<synchronous>, transform_indices = @transform_8, window_bounds = array<i64: 1, 128>}, {transform_indices = @transform_9, window_bounds = array<i64: 16, 128>}]} {
    %c0 = arith.constant 0 : index
    %c0_0 = arith.constant 0 : index
    %0 = vector.load %arg1[%c0, %c0_0] : memref<16x32xf32, #tpu.memory_space<vmem>>, vector<16x32xf32>
    %1 = arith.truncf %0 : vector<16x32xf32> to vector<16x32xbf16>
    %c0_1 = arith.constant 0 : index
    %c0_2 = arith.constant 0 : index
    %2 = vector.load %arg2[%c0_1, %c0_2] : memref<16x16xf32, #tpu.memory_space<vmem>>, vector<16x16xf32>
    %3 = arith.truncf %2 : vector<16x16xf32> to vector<16x16xbf16>
    %c0_3 = arith.constant 0 : index
    %c0_4 = arith.constant 0 : index
    %4 = vector.load %arg3[%c0_3, %c0_4] : memref<32x128xbf16, #tpu.memory_space<vmem>>, vector<32x128xbf16>
    %cst = arith.constant dense<0.000000e+00> : vector<16x128xf32>
    %5 = tpu.matmul %1, %4, %cst {dimension_numbers = #tpu.dot_dimension_numbers<[1], [0], [0], [1], [0, 0, 1, 1], [], []>} : vector<16x32xbf16>, vector<32x128xbf16>, vector<16x128xf32> -> vector<16x128xf32>
    %c0_5 = arith.constant 0 : index
    %c0_6 = arith.constant 0 : index
    %6 = vector.load %arg4[%c0_5, %c0_6] : memref<1x128xf32, #tpu.memory_space<vmem>>, vector<1x128xf32>
    %7 = vector.broadcast %6 : vector<1x128xf32> to vector<16x128xf32>
    %8 = arith.addf %5, %7 : vector<16x128xf32>
    %cst_7 = arith.constant 0.000000e+00 : f32
    %9 = vector.broadcast %cst_7 : f32 to vector<16x128xf32>
    %10 = arith.maximumf %8, %9 : vector<16x128xf32>
    %11 = arith.truncf %10 : vector<16x128xf32> to vector<16x128xbf16>
    %c0_8 = arith.constant 0 : index
    %c0_9 = arith.constant 0 : index
    %12 = vector.load %arg5[%c0_8, %c0_9] : memref<128x128xbf16, #tpu.memory_space<vmem>>, vector<128x128xbf16>
    %cst_10 = arith.constant dense<0.000000e+00> : vector<16x128xf32>
    %13 = tpu.matmul %11, %12, %cst_10 {dimension_numbers = #tpu.dot_dimension_numbers<[1], [0], [0], [1], [0, 0, 1, 1], [], []>} : vector<16x128xbf16>, vector<128x128xbf16>, vector<16x128xf32> -> vector<16x128xf32>
    %c0_11 = arith.constant 0 : index
    %c0_12 = arith.constant 0 : index
    %14 = vector.load %arg6[%c0_11, %c0_12] : memref<16x128xbf16, #tpu.memory_space<vmem>>, vector<16x128xbf16>
    %cst_13 = arith.constant dense<0.000000e+00> : vector<16x128xf32>
    %15 = tpu.matmul %3, %14, %cst_13 {dimension_numbers = #tpu.dot_dimension_numbers<[1], [0], [0], [1], [0, 0, 1, 1], [], []>} : vector<16x16xbf16>, vector<16x128xbf16>, vector<16x128xf32> -> vector<16x128xf32>
    %16 = arith.addf %13, %15 : vector<16x128xf32>
    %c0_14 = arith.constant 0 : index
    %c0_15 = arith.constant 0 : index
    %17 = vector.load %arg7[%c0_14, %c0_15] : memref<1x128xf32, #tpu.memory_space<vmem>>, vector<1x128xf32>
    %18 = vector.broadcast %17 : vector<1x128xf32> to vector<16x128xf32>
    %19 = arith.addf %16, %18 : vector<16x128xf32>
    %cst_16 = arith.constant 0.000000e+00 : f32
    %20 = vector.broadcast %cst_16 : f32 to vector<16x128xf32>
    %21 = arith.maximumf %19, %20 : vector<16x128xf32>
    %22 = arith.truncf %21 : vector<16x128xf32> to vector<16x128xbf16>
    %c0_17 = arith.constant 0 : index
    %c0_18 = arith.constant 0 : index
    %23 = vector.load %arg8[%c0_17, %c0_18] : memref<128x128xbf16, #tpu.memory_space<vmem>>, vector<128x128xbf16>
    %cst_19 = arith.constant dense<0.000000e+00> : vector<16x128xf32>
    %24 = tpu.matmul %22, %23, %cst_19 {dimension_numbers = #tpu.dot_dimension_numbers<[1], [0], [0], [1], [0, 0, 1, 1], [], []>} : vector<16x128xbf16>, vector<128x128xbf16>, vector<16x128xf32> -> vector<16x128xf32>
    %c0_20 = arith.constant 0 : index
    %c0_21 = arith.constant 0 : index
    %25 = vector.load %arg9[%c0_20, %c0_21] : memref<1x128xf32, #tpu.memory_space<vmem>>, vector<1x128xf32>
    %26 = vector.broadcast %25 : vector<1x128xf32> to vector<16x128xf32>
    %27 = arith.addf %24, %26 : vector<16x128xf32>
    %cst_22 = arith.constant dense<0xFF800000> : vector<16xf32>
    %28 = vector.multi_reduction <maximumf>, %27, %cst_22 [1] : vector<16x128xf32> to vector<16xf32>
    %29 = vector.shape_cast %28 : vector<16xf32> to vector<16x1xf32>
    %30 = vector.broadcast %29 : vector<16x1xf32> to vector<16x128xf32>
    %31 = arith.subf %27, %30 : vector<16x128xf32>
    %32 = math.exp %31 : vector<16x128xf32>
    %cst_23 = arith.constant dense<0.000000e+00> : vector<16xf32>
    %33 = vector.multi_reduction <add>, %32, %cst_23 [1] : vector<16x128xf32> to vector<16xf32>
    %34 = vector.shape_cast %33 : vector<16xf32> to vector<16x1xf32>
    %35 = vector.broadcast %34 : vector<16x1xf32> to vector<16x128xf32>
    %36 = arith.divf %32, %35 : vector<16x128xf32>
    %c0_24 = arith.constant 0 : index
    %c0_25 = arith.constant 0 : index
    %37 = vector.load %arg10[%c0_24, %c0_25] : memref<16x128xf32, #tpu.memory_space<vmem>>, vector<16x128xf32>
    tpu.vector_store %arg10[%c0_24, %c0_25], %36 {strides = array<i32>} : memref<16x128xf32, #tpu.memory_space<vmem>>, vector<16x128xf32>,
    return
  }
  func.func @transform_0(%arg0: i32) -> (i32, i32) {
    %c0_i32 = arith.constant 0 : i32
    %c0_i32_0 = arith.constant 0 : i32
    return %arg0, %c0_i32 : i32, i32
  }
  func.func @transform_1(%arg0: i32) -> (i32, i32) {
    %c0_i32 = arith.constant 0 : i32
    %c0_i32_0 = arith.constant 0 : i32
    return %arg0, %c0_i32 : i32, i32
  }
  func.func @transform_2(%arg0: i32) -> (i32, i32) {
    %c0_i32 = arith.constant 0 : i32
    %c0_i32_0 = arith.constant 0 : i32
    %c0_i32_1 = arith.constant 0 : i32
    return %c0_i32, %c0_i32_0 : i32, i32
  }
  func.func @transform_3(%arg0: i32) -> (i32, i32) {
    %c0_i32 = arith.constant 0 : i32
    %c0_i32_0 = arith.constant 0 : i32
    %c0_i32_1 = arith.constant 0 : i32
    return %c0_i32, %c0_i32_0 : i32, i32
  }
  func.func @transform_4(%arg0: i32) -> (i32, i32) {
    %c0_i32 = arith.constant 0 : i32
    %c0_i32_0 = arith.constant 0 : i32
    %c0_i32_1 = arith.constant 0 : i32
    return %c0_i32, %c0_i32_0 : i32, i32
  }
  func.func @transform_5(%arg0: i32) -> (i32, i32) {
    %c0_i32 = arith.constant 0 : i32
    %c0_i32_0 = arith.constant 0 : i32
    %c0_i32_1 = arith.constant 0 : i32
    return %c0_i32, %c0_i32_0 : i32, i32
  }
  func.func @transform_6(%arg0: i32) -> (i32, i32) {
    %c0_i32 = arith.constant 0 : i32
    %c0_i32_0 = arith.constant 0 : i32
    %c0_i32_1 = arith.constant 0 : i32
    return %c0_i32, %c0_i32_0 : i32, i32
  }
  func.func @transform_7(%arg0: i32) -> (i32, i32) {
    %c0_i32 = arith.constant 0 : i32
    %c0_i32_0 = arith.constant 0 : i32
    %c0_i32_1 = arith.constant 0 : i32
    return %c0_i32, %c0_i32_0 : i32, i32
  }
  func.func @transform_8(%arg0: i32) -> (i32, i32) {
    %c0_i32 = arith.constant 0 : i32
    %c0_i32_0 = arith.constant 0 : i32
    %c0_i32_1 = arith.constant 0 : i32
    return %c0_i32, %c0_i32_0 : i32, i32
  }
  func.func @transform_9(%arg0: i32) -> (i32, i32) {
    %c0_i32 = arith.constant 0 : i32
    %c0_i32_0 = arith.constant 0 : i32
    return %arg0, %c0_i32 : i32, i32
  }
}

</mosaic_0001>

<bundles_post_ra>
// kernel: tpu_custom_call.1
= control target key start
LH: loop header
LB: loop body
LE: loop exit
PB: predicated region body
PF: predicated region fallthrough
CT: control target
= control target key end

     0   :  { %14 = vsyncpa [#allocation3], 0  ;;  %s971_s0 = inlined_call_operand.hbm [shape: f32[16,32], index: 0, kind: input, shape index: {}]   ;;  %s972_s1 = inlined_call_operand.hbm [shape: f32[16,16], index: 1, kind: input, shape index: {}]   ;;  %s973_s2 = inlined_call_operand.hbm [shape: bf16[32,128], index: 2, kind: input, shape index: {}]   ;;  %s974_s3 = inlined_call_operand.vmem [shape: f32[1,128], index: 3, kind: input, shape index: {}]   ;;  %s975_s4 = inlined_call_operand.hbm [shape: bf16[128,128], index: 4, kind: input, shape index: {}]   ;;  %s976_s5 = inlined_call_operand.vmem [shape: bf16[16,128], index: 5, kind: input, shape index: {}]   ;;  %s977_s6 = inlined_call_operand.vmem [shape: f32[1,128], index: 6, kind: input, shape index: {}]   ;;  %s978_s7 = inlined_call_operand.hbm [shape: bf16[128,128], index: 7, kind: input, shape index: {}]   ;;  %s979_s8 = inlined_call_operand.vmem [shape: f32[1,128], index: 8, kind: input, shape index: {}]   ;;  %s980_s9 = inlined_call_operand.hbm [shape: f32[16,128], index: 9, kind: output, shape index: {}]  }
   0x1   :  { %15 = vsyncpa [#allocation6], 0 }
   0x2   :  { %16 = vsyncpa [#allocation9], 0 }
   0x3   :  { %17 = vsyncpa [#allocation4], 0  ;;  %s780_s30 = smov [#allocation5]   ;;  %s640_s13 = scalar_lea.hbm %s972_s1, 256 }
   0x4   :  { %s35_s10 = sshll.u32 %s780_s30, 4  ;;  %p641_p0 = scmp.ne.s32.totalorder %s972_s1, %s640_s13  ;;  %s36_s10 = int_to_ptr.vmem [resolvable:$true] %s35_s10 }
   0x5   :  { %p644_p1 = scmp.lt.u32.totalorder %s640_s13, %s972_s1 }
   0x7   :  { %p646_p2 = pnand %p644_p1, %p641_p0 }
   0x9   :  { %649 = shalt.err (!%p646_p2)
}
   0xa   :  { %s650_s18 = scalar_lea.vmem %s36_s10, 256  ;;  %p655_p4 = scmp.lt.s32.totalorder %s36_s10, %s36_s10 }
   0xb   :  { %p651_p3 = scmp.ne.s32.totalorder %s36_s10, %s650_s18  ;;  %p656_p5 = scmp.lt.s32.totalorder %s650_s18, %s650_s18 }
   0xd   :  { %p657_p6 = por %p656_p5, %p655_p4 }
   0xf   :  { %p658_p7 = pnand %p657_p6, %p651_p3 }
  0x11   :  { %661 = shalt.err (!%p658_p7)
}
  0x12   :  { %s781_s19 = smov 128   ;;  %s782_s20 = smov 8  }
  0x13   :  { %41 = dma.hbm_to_vmem [thread:$0]  %s972_s1, 256, %s36_s10, [#allocation6], %s781_s19, %s781_s19, %s782_s20  }
  0x14   :  { %s783_s23 = smov [#allocation8]   ;;  %s784_s25 = smov [#allocation2]  }
  0x15   :  { %s61_s24 = sshll.u32 %s783_s23, 4  ;;  %s23_s26 = sshll.u32 %s784_s25, 4  ;;  %s62_s24 = int_to_ptr.vmem [resolvable:$true] %s61_s24  ;;  %s24_s26 = int_to_ptr.vmem [resolvable:$true] %s23_s26 }
  0x16   :  { %s662_s29 = scalar_lea.hbm %s975_s4, 1024 }
  0x17   :  { %p663_p8 = scmp.ne.s32.totalorder %s975_s4, %s662_s29  ;;  %p666_p9 = scmp.lt.u32.totalorder %s662_s29, %s975_s4 }
  0x19   :  { %p668_p10 = pnand %p666_p9, %p663_p8 }
  0x1b   :  { %671 = shalt.err (!%p668_p10)
}
  0x1c   :  { %s672_s1 = scalar_lea.vmem %s62_s24, 1024  ;;  %p677_p12 = scmp.lt.s32.totalorder %s62_s24, %s62_s24 }
  0x1d   :  { %p673_p11 = scmp.ne.s32.totalorder %s62_s24, %s672_s1  ;;  %p678_p13 = scmp.lt.s32.totalorder %s672_s1, %s672_s1 }
  0x1f   :  { %p679_p0 = por %p678_p13, %p677_p12 }
  0x21   :  { %p680_p1 = pnand %p679_p0, %p673_p11 }
  0x23   :  { %683 = shalt.err (!%p680_p1)
}
  0x24   :  { %s785_s10 = smov 64   ;;  %s786_s14 = smov 4  }
  0x25   :  { %67 = dma.hbm_to_vmem [thread:$0]  %s975_s4, 1024, %s62_s24, [#allocation9], %s785_s10, %s785_s10, %s786_s14  }
  0x26   :  { %s684_s21 = scalar_lea.hbm %s971_s0, 256 }
  0x27   :  { %p685_p2 = scmp.ne.s32.totalorder %s971_s0, %s684_s21  ;;  %p688_p3 = scmp.lt.u32.totalorder %s684_s21, %s971_s0 }
  0x29   :  { %p690_p4 = pnand %p688_p3, %p685_p2 }
  0x2b   :  { %693 = shalt.err (!%p690_p4)
}
  0x2c   :  { %s694_s28 = scalar_lea.vmem %s24_s26, 256  ;;  %p699_p6 = scmp.lt.s32.totalorder %s24_s26, %s24_s26 }
  0x2d   :  { %p695_p5 = scmp.ne.s32.totalorder %s24_s26, %s694_s28  ;;  %p700_p7 = scmp.lt.s32.totalorder %s694_s28, %s694_s28 }
  0x2f   :  { %p701_p8 = por %p700_p7, %p699_p6 }
  0x31   :  { %p702_p9 = pnand %p701_p8, %p695_p5 }
  0x33   :  { %705 = shalt.err (!%p702_p9)
}
  0x34   :  { %29 = dma.hbm_to_vmem [thread:$0]  %s971_s0, 256, %s24_s26, [#allocation3], %s781_s19, %s781_s19, %s782_s20  }
  0x35   :  { %s787_s29 = smov [#allocation7]   ;;  %s788_s11 = smov [#allocation10]  }
  0x36   :  { %s47_s30 = sshll.u32 %s787_s29, 4  ;;  %s77_s12 = sshll.u32 %s788_s11, 4  ;;  %s48_s30 = int_to_ptr.vmem [resolvable:$true] %s47_s30  ;;  %s78_s12 = int_to_ptr.vmem [resolvable:$true] %s77_s12 }
  0x37   :  { %s706_s15 = scalar_lea.hbm %s973_s2, 256 }
  0x38   :  { %p707_p10 = scmp.ne.s32.totalorder %s973_s2, %s706_s15  ;;  %p710_p11 = scmp.lt.u32.totalorder %s706_s15, %s973_s2 }
  0x3a   :  { %p712_p12 = pnand %p710_p11, %p707_p10 }
  0x3c   :  { %715 = shalt.err (!%p712_p12)
}
  0x3d   :  { %s716_s0 = scalar_lea.vmem %s48_s30, 256  ;;  %p721_p0 = scmp.lt.s32.totalorder %s48_s30, %s48_s30 }
  0x3e   :  { %p717_p13 = scmp.ne.s32.totalorder %s48_s30, %s716_s0  ;;  %p722_p1 = scmp.lt.s32.totalorder %s716_s0, %s716_s0 }
  0x40   :  { %p723_p2 = por %p722_p1, %p721_p0 }
  0x42   :  { %p724_p3 = pnand %p723_p2, %p717_p13 }
  0x44   :  { %727 = shalt.err (!%p724_p3)
}
  0x45   :  { %53 = dma.hbm_to_vmem [thread:$0]  %s973_s2, 256, %s48_s30, [#allocation6], %s785_s10, %s785_s10, %s786_s14  }
  0x46   :  { %s728_s27 = scalar_lea.hbm %s978_s7, 1024 }
  0x47   :  { %p729_p4 = scmp.ne.s32.totalorder %s978_s7, %s728_s27  ;;  %p732_p5 = scmp.lt.u32.totalorder %s728_s27, %s978_s7 }
  0x49   :  { %p734_p6 = pnand %p732_p5, %p729_p4 }
  0x4b   :  { %737 = shalt.err (!%p734_p6)
}
  0x4c   :  { %s738_s11 = scalar_lea.vmem %s78_s12, 1024  ;;  %p743_p8 = scmp.lt.s32.totalorder %s78_s12, %s78_s12 }
  0x4d   :  { %p739_p7 = scmp.ne.s32.totalorder %s78_s12, %s738_s11  ;;  %p744_p9 = scmp.lt.s32.totalorder %s738_s11, %s738_s11 }
  0x4f   :  { %p745_p10 = por %p744_p9, %p743_p8 }
  0x51   :  { %p746_p11 = pnand %p745_p10, %p739_p7 }
  0x53   :  { %749 = shalt.err (!%p746_p11)
}
  0x54   :  { %83 = dma.hbm_to_vmem [thread:$0]  %s978_s7, 1024, %s78_s12, [#allocation9], %s785_s10, %s785_s10, %s786_s14  }
  0x55   :  { %772 = dma.done.wait [#allocation3], 256  }
  0x56   :  { %773 = vsyncadd [#allocation3], 4294967040 }
  0x57   :  { %774 = dma.done.wait [#allocation6], 512  }
  0x58   :  { %775 = vsyncadd [#allocation6], 4294966784 }
  0x59   :  { %776 = dma.done.wait [#allocation9], 2048  }
  0x5a   :  { %777 = vsyncadd [#allocation9], 4294965248  ;;  %v789_v0 = vmov 0.0   ;;  %vm790_vm0 = vmmov 0   ;;  %v613_v1 = vld [vmem:[#allocation7] sm:$0xff]   ;;  %v614_v2 = vld [vmem:[#allocation7 + $0x8] sm:$0xff]  }
  0x5b   :  { %547 = vmatprep.subr.bf16.mxu0 %v789_v0  ;;  %551 = vmatprep.mubr.msk.bf16.mxu0 %vm790_vm0, %v789_v0  ;;  %v102_v3 = vld [vmem:[#allocation2] sm:$0xff]  ;;  %v103_v4 = vld [vmem:[#allocation2 + $0x8] sm:$0xff]  ;;  %v105_v6 = vld [vmem:[#allocation5] sm:$0xff]  ;;  %vm203_vm1 = vcmask 130048   ;;  %vm131_vm2 = vcmask 261120  }
  0x5c   :  { %555 = vmatprep.subr.bf16.mxu1 %v789_v0  ;;  %557 = vmatprep.mubr.msk.bf16.mxu1 %vm790_vm0, %v789_v0  ;;  %v615_v5 = vld [vmem:[%s976_s5] sm:$0xff]   ;;  %v106_v7 = vld [vmem:[#allocation5 + $0x8] sm:$0xff]  ;;  %v104_v8 = vpack.c.bf16 %v103_v4, %v102_v3  ;;  %v616_v10 = vld [vmem:[#allocation8] sm:$0xff]  }
  0x5d   :  { %548 = vmatpush3.bf16.msra.mxu0 %v613_v1  ;;  %556 = vmatpush3.bf16.msra.mxu1 %v615_v5  ;;  %v107_v9 = vpack.c.bf16 %v106_v7, %v105_v6  ;;  %v617_v11 = vld [vmem:[#allocation8 + $0x8] sm:$0xff]   ;;  %v618_v12 = vld [vmem:[#allocation8 + $0x10] sm:$0xff]   ;;  %v619_v13 = vld [vmem:[#allocation8 + $0x18] sm:$0xff]  }
  0x5e   :  { %549 = vmatprep.subr.bf16.mxu0 %v789_v0  ;;  %561 = vmatprep.subr.bf16.mxu1 %v789_v0  ;;  %v620_v14 = vld [vmem:[#allocation8 + $0x20] sm:$0xff]   ;;  %v621_v15 = vld [vmem:[#allocation8 + $0x28] sm:$0xff]   ;;  %v622_v16 = vld [vmem:[#allocation8 + $0x30] sm:$0xff]  }
  0x5f   :  { %v623_v17 = vld [vmem:[#allocation8 + $0x38] sm:$0xff]   ;;  %v624_v18 = vld [vmem:[#allocation10] sm:$0xff]   ;;  %v625_v19 = vld [vmem:[#allocation10 + $0x8] sm:$0xff]  }
  0x60   :  { %558 = vmatmul.mubr.msk.bf16.vlgmr.msra.gmra.mrb[0].mxu1 %vm203_vm1, %v107_v9  ;;  %v626_v20 = vld [vmem:[#allocation10 + $0x10] sm:$0xff]   ;;  %v627_v21 = vld [vmem:[#allocation10 + $0x18] sm:$0xff]   ;;  %v628_v22 = vld [vmem:[#allocation10 + $0x20] sm:$0xff]  }
  0x61   :  { %550 = vmatpush3.bf16.msra.mxu0 %v614_v2  ;;  %562 = vmatpush3.bf16.msra.mxu1 %v616_v10  ;;  %v500_v23 = vld [vmem:[%s974_s3] ss:$0 sm:$0xff]  ;;  %v629_v37 = vld [vmem:[#allocation10 + $0x28] sm:$0xff]   ;;  %v631_v39 = vld [vmem:[#allocation10 + $0x38] sm:$0xff]  }
  0x62   :  { %581 = vmatprep.subr.bf16.mxu0 %v789_v0  ;;  %563 = vmatprep.subr.bf16.mxu1 %v789_v0  ;;  %v630_v38 = vld [vmem:[#allocation10 + $0x30] sm:$0xff]  }
  0x63   :  { %577 = vmatprep.mubr.msk.bf16.mxu1 %vm790_vm0, %v789_v0  ;;  %v514_v41 = vld [vmem:[%s977_s6] ss:$0 sm:$0xff]  ;;  %s791_s6 = smov [#allocation11]  }
  0x64   :  { %552 = vmatmul.mubr.msk.bf16.vlgmr.msra.gmra.mrb[0].mxu0 %vm131_vm2, %v104_v8  ;;  %v515_v52 = vld [vmem:[%s979_s8] ss:$0 sm:$0xff]  ;;  %s486_s8 = sshll.u32 %s791_s6, 4  ;;  %s487_s8 = int_to_ptr.vmem [resolvable:$true] %s486_s8 }
  0x65   :  { %597 = vmatprep.mubr.msk.bf16.mxu0 %vm790_vm0, %v789_v0  ;;  %564 = vmatpush3.bf16.msra.mxu1 %v617_v11  ;;  %s750_s15 = scalar_lea.vmem %s487_s8, 256  ;;  %p755_p13 = scmp.lt.s32.totalorder %s487_s8, %s487_s8 }
  0x66   :  { %565 = vmatprep.subr.bf16.mxu1 %v789_v0  ;;  %582 = vmatpush3.bf16.msra.mxu0 %v624_v18  ;;  %p751_p12 = scmp.ne.s32.totalorder %s487_s8, %s750_s15  ;;  %p756_p0 = scmp.lt.s32.totalorder %s750_s15, %s750_s15 }
  0x67   :  { %583 = vmatprep.subr.bf16.mxu0 %v789_v0 }
  0x68   :  { %p757_p1 = por %p756_p0, %p755_p13 }
  0x69   :  { %566 = vmatpush3.bf16.msra.mxu1 %v618_v12 }
  0x6a   :  { %567 = vmatprep.subr.bf16.mxu1 %v789_v0  ;;  %584 = vmatpush3.bf16.msra.mxu0 %v625_v19  ;;  %p758_p2 = pnand %p757_p1, %p751_p12 }
  0x6b   :  { %585 = vmatprep.subr.bf16.mxu0 %v789_v0 }
  0x6d   :  { %568 = vmatpush3.bf16.msra.mxu1 %v619_v13 }
  0x6e   :  { %569 = vmatprep.subr.bf16.mxu1 %v789_v0  ;;  %586 = vmatpush3.bf16.msra.mxu0 %v626_v20 }
  0x6f   :  { %587 = vmatprep.subr.bf16.mxu0 %v789_v0 }
  0x71   :  { %570 = vmatpush3.bf16.msra.mxu1 %v620_v14 }
  0x72   :  { %571 = vmatprep.subr.bf16.mxu1 %v789_v0  ;;  %588 = vmatpush3.bf16.msra.mxu0 %v627_v21 }
  0x73   :  { %589 = vmatprep.subr.bf16.mxu0 %v789_v0 }
  0x75   :  { %572 = vmatpush3.bf16.msra.mxu1 %v621_v15 }
  0x76   :  { %573 = vmatprep.subr.bf16.mxu1 %v789_v0  ;;  %590 = vmatpush3.bf16.msra.mxu0 %v628_v22 }
  0x77   :  { %591 = vmatprep.subr.bf16.mxu0 %v789_v0 }
  0x79   :  { %574 = vmatpush3.bf16.msra.mxu1 %v622_v16 }
  0x7a   :  { %575 = vmatprep.subr.bf16.mxu1 %v789_v0  ;;  %592 = vmatpush3.bf16.msra.mxu0 %v629_v37 }
  0x7b   :  { %593 = vmatprep.subr.bf16.mxu0 %v789_v0 }
  0x7d   :  { %576 = vmatpush3.bf16.msra.mxu1 %v623_v17 }
  0x7e   :  { %594 = vmatpush3.bf16.msra.mxu0 %v630_v38 }
  0x7f   :  { %595 = vmatprep.subr.bf16.mxu0 %v789_v0 }
  0x82   :  { %596 = vmatpush3.bf16.msra.mxu0 %v631_v39 }
 0x133   :  { %v241_v24 = vpop.f32.mrb[0].mxu1 }
 0x134   :  { %v559_v26 = vpop.f32.mrb[1].mxu1 }
 0x135   :  { %v244_v29 = vpop.f32.mrb[2].mxu1 }
 0x136   :  { %v560_v31 = vpop.f32.mrb[3].mxu1 }
 0x137   :  { %v169_v25 = vpop.f32.mrb[0].mxu0 }
 0x138   :  { %v170_v27 = vadd.f32 %v500_v23, %v169_v25  ;;  %v553_v28 = vpop.f32.mrb[1].mxu0 }
 0x139   :  { %v172_v30 = vpop.f32.mrb[2].mxu0 }
 0x13a   :  { %v173_v32 = vadd.f32 %v500_v23, %v172_v30  ;;  %v554_v33 = vpop.f32.mrb[3].mxu0  ;;  %v176_v34 = vmax.f32 %v170_v27, 0.0 }
 0x13c   :  { %v177_v35 = vmax.f32 %v173_v32, 0.0 }
 0x13e   :  { %v178_v36 = vpack.c.bf16 %v177_v35, %v176_v34 }
 0x140   :  { %578 = vmatmul.mubr.bf16.vlgmr.msra.gmra.mrb[4].mxu1 %v178_v36 }
 0x213   :  { %v330_v40 = vpop.f32.mrb[4].mxu1 }
 0x214   :  { %v331_v42 = vadd.f32 %v330_v40, %v241_v24  ;;  %v579_v43 = vpop.f32.mrb[5].mxu1 }
 0x215   :  { %v333_v44 = vpop.f32.mrb[6].mxu1 }
 0x216   :  { %v344_v45 = vadd.f32 %v514_v41, %v331_v42  ;;  %v334_v46 = vadd.f32 %v333_v44, %v244_v29  ;;  %v580_v47 = vpop.f32.mrb[7].mxu1 }
 0x218   :  { %v345_v48 = vadd.f32 %v514_v41, %v334_v46  ;;  %v346_v49 = vmax.f32 %v344_v45, 0.0 }
 0x21a   :  { %v347_v50 = vmax.f32 %v345_v48, 0.0 }
 0x21c   :  { %v348_v51 = vpack.c.bf16 %v347_v50, %v346_v49 }
 0x21e   :  { %598 = vmatmul.mubr.bf16.vlgmr.msra.gmra.mrb[4].mxu0 %v348_v51 }
 0x2f1   :  { %v454_v53 = vpop.f32.mrb[4].mxu0 }
 0x2f2   :  { %v455_v54 = vadd.f32 %v515_v52, %v454_v53  ;;  %v599_v55 = vpop.f32.mrb[5].mxu0 }
 0x2f3   :  { %v457_v56 = vpop.f32.mrb[6].mxu0 }
 0x2f4   :  { %461 = vmax.xlane.f32.xlu0 %v455_v54  ;;  %v600_v57 = vpop.f32.mrb[7].mxu0  ;;  %v458_v58 = vadd.f32 %v515_v52, %v457_v56 }
 0x2f8   :  { %463 = vmax.xlane.f32.xlu0 %v458_v58 }
 0x381   :  { %v462_v59 = vpop.xlane.xlu0 %461 }
 0x382   :  { %v465_v60 = vsub.f32 %v455_v54, %v462_v59 }
 0x384   :  { %v467_v61 = vmul.f32 1.442695, %v465_v60 }
 0x385   :  { %v464_v62 = vpop.xlane.xlu0 %463 }
 0x386   :  { %632 = vpow2.f32 %v467_v61  ;;  %v466_v63 = vsub.f32 %v458_v58, %v464_v62 }
 0x388   :  { %v469_v0 = vmul.f32 1.442695, %v466_v63 }
 0x38a   :  { %634 = vpow2.f32 %v469_v0 }
 0x390   :  { %v633_v1 = vpop.eup %632 }
 0x391   :  { %471 = vadd.xlane.f32.xlu1 %v633_v1 }
 0x394   :  { %v635_v2 = vpop.eup %634 }
 0x395   :  { %473 = vadd.xlane.f32.xlu1 %v635_v2 }
 0x41e   :  { %v472_v3 = vpop.xlane.xlu1 %471 }
 0x41f   :  { %636 = vrcp.f32 %v472_v3 }
 0x422   :  { %v474_v4 = vpop.xlane.xlu1 %473 }
 0x423   :  { %638 = vrcp.f32 %v474_v4 }
 0x429   :  { %v637_v5 = vpop.eup %636 }
 0x42a   :  { %v476_v6 = vmul.f32 %v637_v5, %v633_v1 }
 0x42c   :  { %479 = vst [vmem:[#allocation11] sm:$0xff] %v476_v6 }
 0x42d   :  { %v639_v7 = vpop.eup %638 }
 0x42e   :  { %v478_v8 = vmul.f32 %v639_v7, %v635_v2 }
 0x430   :  { %480 = vst [vmem:[#allocation11 + $0x8] sm:$0xff] %v478_v8 }
 0x431   :  { %761 = shalt.err (!%p758_p2)
}
 0x432   :  { %s762_s18 = scalar_lea.hbm %s980_s9, 256 }
 0x433   :  { %p763_p3 = scmp.ne.s32.totalorder %s980_s9, %s762_s18  ;;  %p766_p4 = scmp.lt.u32.totalorder %s762_s18, %s980_s9 }
 0x435   :  { %p768_p5 = pnand %p766_p4, %p763_p3 }
 0x437   :  { %771 = shalt.err (!%p768_p5)
}
 0x438   :  { %492 = dma.vmem_to_hbm [thread:$0]  %s487_s8, 256, %s980_s9, [#allocation4], %s781_s19, %s781_s19, %s782_s20  }
 0x439   :  { %778 = dma.done.wait [#allocation4], 256  }
 0x43a   :  { %779 = vsyncadd [#allocation4], 4294967040 }
 0x43b   :  { %496 = vsyncpa [#allocation3], 1 }
 0x43c   :  { %497 = vsyncpa [#allocation6], 1 }
 0x43d   :  { %498 = vsyncpa [#allocation9], 1 }
 0x43e   :  { %499 = vsyncpa [#allocation4], 1 }

// kernel: tpu_custom_call.1
= control target key start
LH: loop header
LB: loop body
LE: loop exit
PB: predicated region body
PF: predicated region fallthrough
CT: control target
= control target key end

     0   :  { %14 = vsyncpa [#allocation3], 0  ;;  %s971_s0 = inlined_call_operand.hbm [shape: f32[16,32], index: 0, kind: input, shape index: {}]   ;;  %s972_s1 = inlined_call_operand.hbm [shape: f32[16,16], index: 1, kind: input, shape index: {}]   ;;  %s973_s2 = inlined_call_operand.hbm [shape: bf16[32,128], index: 2, kind: input, shape index: {}]   ;;  %s974_s3 = inlined_call_operand.vmem [shape: f32[1,128], index: 3, kind: input, shape index: {}]   ;;  %s975_s4 = inlined_call_operand.hbm [shape: bf16[128,128], index: 4, kind: input, shape index: {}]   ;;  %s976_s5 = inlined_call_operand.vmem [shape: bf16[16,128], index: 5, kind: input, shape index: {}]   ;;  %s977_s6 = inlined_call_operand.vmem [shape: f32[1,128], index: 6, kind: input, shape index: {}]   ;;  %s978_s7 = inlined_call_operand.hbm [shape: bf16[128,128], index: 7, kind: input, shape index: {}]   ;;  %s979_s8 = inlined_call_operand.vmem [shape: f32[1,128], index: 8, kind: input, shape index: {}]   ;;  %s980_s9 = inlined_call_operand.hbm [shape: f32[16,128], index: 9, kind: output, shape index: {}]  }
   0x1   :  { %15 = vsyncpa [#allocation6], 0 }
   0x2   :  { %16 = vsyncpa [#allocation9], 0 }
   0x3   :  { %17 = vsyncpa [#allocation4], 0  ;;  %s780_s30 = smov [#allocation5]   ;;  %s640_s13 = scalar_lea.hbm %s972_s1, 256 }
   0x4   :  { %s35_s10 = sshll.u32 %s780_s30, 4  ;;  %p641_p0 = scmp.ne.s32.totalorder %s972_s1, %s640_s13  ;;  %s36_s10 = int_to_ptr.vmem [resolvable:$true] %s35_s10 }
   0x5   :  { %p644_p1 = scmp.lt.u32.totalorder %s640_s13, %s972_s1 }
   0x7   :  { %p646_p2 = pnand %p644_p1, %p641_p0 }
   0x9   :  { %649 = shalt.err (!%p646_p2)
}
   0xa   :  { %s650_s18 = scalar_lea.vmem %s36_s10, 256  ;;  %p655_p4 = scmp.lt.s32.totalorder %s36_s10, %s36_s10 }
   0xb   :  { %p651_p3 = scmp.ne.s32.totalorder %s36_s10, %s650_s18  ;;  %p656_p5 = scmp.lt.s32.totalorder %s650_s18, %s650_s18 }
   0xd   :  { %p657_p6 = por %p656_p5, %p655_p4 }
   0xf   :  { %p658_p7 = pnand %p657_p6, %p651_p3 }
  0x11   :  { %661 = shalt.err (!%p658_p7)
}
  0x12   :  { %s781_s19 = smov 128   ;;  %s782_s20 = smov 8  }
  0x13   :  { %41 = dma.hbm_to_vmem [thread:$0]  %s972_s1, 256, %s36_s10, [#allocation6], %s781_s19, %s781_s19, %s782_s20  }
  0x14   :  { %s783_s23 = smov [#allocation8]   ;;  %s784_s25 = smov [#allocation2]  }
  0x15   :  { %s61_s24 = sshll.u32 %s783_s23, 4  ;;  %s23_s26 = sshll.u32 %s784_s25, 4  ;;  %s62_s24 = int_to_ptr.vmem [resolvable:$true] %s61_s24  ;;  %s24_s26 = int_to_ptr.vmem [resolvable:$true] %s23_s26 }
  0x16   :  { %s662_s29 = scalar_lea.hbm %s975_s4, 1024 }
  0x17   :  { %p663_p8 = scmp.ne.s32.totalorder %s975_s4, %s662_s29  ;;  %p666_p9 = scmp.lt.u32.totalorder %s662_s29, %s975_s4 }
  0x19   :  { %p668_p10 = pnand %p666_p9, %p663_p8 }
  0x1b   :  { %671 = shalt.err (!%p668_p10)
}
  0x1c   :  { %s672_s1 = scalar_lea.vmem %s62_s24, 1024  ;;  %p677_p12 = scmp.lt.s32.totalorder %s62_s24, %s62_s24 }
  0x1d   :  { %p673_p11 = scmp.ne.s32.totalorder %s62_s24, %s672_s1  ;;  %p678_p13 = scmp.lt.s32.totalorder %s672_s1, %s672_s1 }
  0x1f   :  { %p679_p0 = por %p678_p13, %p677_p12 }
  0x21   :  { %p680_p1 = pnand %p679_p0, %p673_p11 }
  0x23   :  { %683 = shalt.err (!%p680_p1)
}
  0x24   :  { %s785_s10 = smov 64   ;;  %s786_s14 = smov 4  }
  0x25   :  { %67 = dma.hbm_to_vmem [thread:$0]  %s975_s4, 1024, %s62_s24, [#allocation9], %s785_s10, %s785_s10, %s786_s14  }
  0x26   :  { %s684_s21 = scalar_lea.hbm %s971_s0, 256 }
  0x27   :  { %p685_p2 = scmp.ne.s32.totalorder %s971_s0, %s684_s21  ;;  %p688_p3 = scmp.lt.u32.totalorder %s684_s21, %s971_s0 }
  0x29   :  { %p690_p4 = pnand %p688_p3, %p685_p2 }
  0x2b   :  { %693 = shalt.err (!%p690_p4)
}
  0x2c   :  { %s694_s28 = scalar_lea.vmem %s24_s26, 256  ;;  %p699_p6 = scmp.lt.s32.totalorder %s24_s26, %s24_s26 }
  0x2d   :  { %p695_p5 = scmp.ne.s32.totalorder %s24_s26, %s694_s28  ;;  %p700_p7 = scmp.lt.s32.totalorder %s694_s28, %s694_s28 }
  0x2f   :  { %p701_p8 = por %p700_p7, %p699_p6 }
  0x31   :  { %p702_p9 = pnand %p701_p8, %p695_p5 }
  0x33   :  { %705 = shalt.err (!%p702_p9)
}
  0x34   :  { %29 = dma.hbm_to_vmem [thread:$0]  %s971_s0, 256, %s24_s26, [#allocation3], %s781_s19, %s781_s19, %s782_s20  }
  0x35   :  { %s787_s29 = smov [#allocation7]   ;;  %s788_s11 = smov [#allocation10]  }
  0x36   :  { %s47_s30 = sshll.u32 %s787_s29, 4  ;;  %s77_s12 = sshll.u32 %s788_s11, 4  ;;  %s48_s30 = int_to_ptr.vmem [resolvable:$true] %s47_s30  ;;  %s78_s12 = int_to_ptr.vmem [resolvable:$true] %s77_s12 }
  0x37   :  { %s706_s15 = scalar_lea.hbm %s973_s2, 256 }
  0x38   :  { %p707_p10 = scmp.ne.s32.totalorder %s973_s2, %s706_s15  ;;  %p710_p11 = scmp.lt.u32.totalorder %s706_s15, %s973_s2 }
  0x3a   :  { %p712_p12 = pnand %p710_p11, %p707_p10 }
  0x3c   :  { %715 = shalt.err (!%p712_p12)
}
  0x3d   :  { %s716_s0 = scalar_lea.vmem %s48_s30, 256  ;;  %p721_p0 = scmp.lt.s32.totalorder %s48_s30, %s48_s30 }
  0x3e   :  { %p717_p13 = scmp.ne.s32.totalorder %s48_s30, %s716_s0  ;;  %p722_p1 = scmp.lt.s32.totalorder %s716_s0, %s716_s0 }
  0x40   :  { %p723_p2 = por %p722_p1, %p721_p0 }
  0x42   :  { %p724_p3 = pnand %p723_p2, %p717_p13 }
  0x44   :  { %727 = shalt.err (!%p724_p3)
}
  0x45   :  { %53 = dma.hbm_to_vmem [thread:$0]  %s973_s2, 256, %s48_s30, [#allocation6], %s785_s10, %s785_s10, %s786_s14  }
  0x46   :  { %s728_s27 = scalar_lea.hbm %s978_s7, 1024 }
  0x47   :  { %p729_p4 = scmp.ne.s32.totalorder %s978_s7, %s728_s27  ;;  %p732_p5 = scmp.lt.u32.totalorder %s728_s27, %s978_s7 }
  0x49   :  { %p734_p6 = pnand %p732_p5, %p729_p4 }
  0x4b   :  { %737 = shalt.err (!%p734_p6)
}
  0x4c   :  { %s738_s11 = scalar_lea.vmem %s78_s12, 1024  ;;  %p743_p8 = scmp.lt.s32.totalorder %s78_s12, %s78_s12 }
  0x4d   :  { %p739_p7 = scmp.ne.s32.totalorder %s78_s12, %s738_s11  ;;  %p744_p9 = scmp.lt.s32.totalorder %s738_s11, %s738_s11 }
  0x4f   :  { %p745_p10 = por %p744_p9, %p743_p8 }
  0x51   :  { %p746_p11 = pnand %p745_p10, %p739_p7 }
  0x53   :  { %749 = shalt.err (!%p746_p11)
}
  0x54   :  { %83 = dma.hbm_to_vmem [thread:$0]  %s978_s7, 1024, %s78_s12, [#allocation9], %s785_s10, %s785_s10, %s786_s14  }
  0x55   :  { %772 = dma.done.wait [#allocation3], 256  }
  0x56   :  { %773 = vsyncadd [#allocation3], 4294967040 }
  0x57   :  { %774 = dma.done.wait [#allocation6], 512  }
  0x58   :  { %775 = vsyncadd [#allocation6], 4294966784 }
  0x59   :  { %776 = dma.done.wait [#allocation9], 2048  }
  0x5a   :  { %777 = vsyncadd [#allocation9], 4294965248  ;;  %v789_v0 = vmov 0.0   ;;  %vm790_vm0 = vmmov 0   ;;  %v613_v1 = vld [vmem:[#allocation7] sm:$0xff]   ;;  %v614_v2 = vld [vmem:[#allocation7 + $0x8] sm:$0xff]  }
  0x5b   :  { %547 = vmatprep.subr.bf16.mxu0 %v789_v0  ;;  %551 = vmatprep.mubr.msk.bf16.mxu0 %vm790_vm0, %v789_v0  ;;  %v102_v3 = vld [vmem:[#allocation2] sm:$0xff]  ;;  %v103_v4 = vld [vmem:[#allocation2 + $0x8] sm:$0xff]  ;;  %v105_v6 = vld [vmem:[#allocation5] sm:$0xff]  ;;  %vm203_vm1 = vcmask 130048   ;;  %vm131_vm2 = vcmask 261120  }
  0x5c   :  { %555 = vmatprep.subr.bf16.mxu1 %v789_v0  ;;  %557 = vmatprep.mubr.msk.bf16.mxu1 %vm790_vm0, %v789_v0  ;;  %v615_v5 = vld [vmem:[%s976_s5] sm:$0xff]   ;;  %v106_v7 = vld [vmem:[#allocation5 + $0x8] sm:$0xff]  ;;  %v104_v8 = vpack.c.bf16 %v103_v4, %v102_v3  ;;  %v616_v10 = vld [vmem:[#allocation8] sm:$0xff]  }
  0x5d   :  { %548 = vmatpush3.bf16.msra.mxu0 %v613_v1  ;;  %556 = vmatpush3.bf16.msra.mxu1 %v615_v5  ;;  %v107_v9 = vpack.c.bf16 %v106_v7, %v105_v6  ;;  %v617_v11 = vld [vmem:[#allocation8 + $0x8] sm:$0xff]   ;;  %v618_v12 = vld [vmem:[#allocation8 + $0x10] sm:$0xff]   ;;  %v619_v13 = vld [vmem:[#allocation8 + $0x18] sm:$0xff]  }
  0x5e   :  { %549 = vmatprep.subr.bf16.mxu0 %v789_v0  ;;  %561 = vmatprep.subr.bf16.mxu1 %v789_v0  ;;  %v620_v14 = vld [vmem:[#allocation8 + $0x20] sm:$0xff]   ;;  %v621_v15 = vld [vmem:[#allocation8 + $0x28] sm:$0xff]   ;;  %v622_v16 = vld [vmem:[#allocation8 + $0x30] sm:$0xff]  }
  0x5f   :  { %v623_v17 = vld [vmem:[#allocation8 + $0x38] sm:$0xff]   ;;  %v624_v18 = vld [vmem:[#allocation10] sm:$0xff]   ;;  %v625_v19 = vld [vmem:[#allocation10 + $0x8] sm:$0xff]  }
  0x60   :  { %558 = vmatmul.mubr.msk.bf16.vlgmr.msra.gmra.mrb[0].mxu1 %vm203_vm1, %v107_v9  ;;  %v626_v20 = vld [vmem:[#allocation10 + $0x10] sm:$0xff]   ;;  %v627_v21 = vld [vmem:[#allocation10 + $0x18] sm:$0xff]   ;;  %v628_v22 = vld [vmem:[#allocation10 + $0x20] sm:$0xff]  }
  0x61   :  { %550 = vmatpush3.bf16.msra.mxu0 %v614_v2  ;;  %562 = vmatpush3.bf16.msra.mxu1 %v616_v10  ;;  %v500_v23 = vld [vmem:[%s974_s3] ss:$0 sm:$0xff]  ;;  %v629_v37 = vld [vmem:[#allocation10 + $0x28] sm:$0xff]   ;;  %v631_v39 = vld [vmem:[#allocation10 + $0x38] sm:$0xff]  }
  0x62   :  { %581 = vmatprep.subr.bf16.mxu0 %v789_v0  ;;  %563 = vmatprep.subr.bf16.mxu1 %v789_v0  ;;  %v630_v38 = vld [vmem:[#allocation10 + $0x30] sm:$0xff]  }
  0x63   :  { %577 = vmatprep.mubr.msk.bf16.mxu1 %vm790_vm0, %v789_v0  ;;  %v514_v41 = vld [vmem:[%s977_s6] ss:$0 sm:$0xff]  ;;  %s791_s6 = smov [#allocation11]  }
  0x64   :  { %552 = vmatmul.mubr.msk.bf16.vlgmr.msra.gmra.mrb[0].mxu0 %vm131_vm2, %v104_v8  ;;  %v515_v52 = vld [vmem:[%s979_s8] ss:$0 sm:$0xff]  ;;  %s486_s8 = sshll.u32 %s791_s6, 4  ;;  %s487_s8 = int_to_ptr.vmem [resolvable:$true] %s486_s8 }
  0x65   :  { %597 = vmatprep.mubr.msk.bf16.mxu0 %vm790_vm0, %v789_v0  ;;  %564 = vmatpush3.bf16.msra.mxu1 %v617_v11  ;;  %s750_s15 = scalar_lea.vmem %s487_s8, 256  ;;  %p755_p13 = scmp.lt.s32.totalorder %s487_s8, %s487_s8 }
  0x66   :  { %565 = vmatprep.subr.bf16.mxu1 %v789_v0  ;;  %582 = vmatpush3.bf16.msra.mxu0 %v624_v18  ;;  %p751_p12 = scmp.ne.s32.totalorder %s487_s8, %s750_s15  ;;  %p756_p0 = scmp.lt.s32.totalorder %s750_s15, %s750_s15 }
  0x67   :  { %583 = vmatprep.subr.bf16.mxu0 %v789_v0 }
  0x68   :  { %p757_p1 = por %p756_p0, %p755_p13 }
  0x69   :  { %566 = vmatpush3.bf16.msra.mxu1 %v618_v12 }
  0x6a   :  { %567 = vmatprep.subr.bf16.mxu1 %v789_v0  ;;  %584 = vmatpush3.bf16.msra.mxu0 %v625_v19  ;;  %p758_p2 = pnand %p757_p1, %p751_p12 }
  0x6b   :  { %585 = vmatprep.subr.bf16.mxu0 %v789_v0 }
  0x6d   :  { %568 = vmatpush3.bf16.msra.mxu1 %v619_v13 }
  0x6e   :  { %569 = vmatprep.subr.bf16.mxu1 %v789_v0  ;;  %586 = vmatpush3.bf16.msra.mxu0 %v626_v20 }
  0x6f   :  { %587 = vmatprep.subr.bf16.mxu0 %v789_v0 }
  0x71   :  { %570 = vmatpush3.bf16.msra.mxu1 %v620_v14 }
  0x72   :  { %571 = vmatprep.subr.bf16.mxu1 %v789_v0  ;;  %588 = vmatpush3.bf16.msra.mxu0 %v627_v21 }
  0x73   :  { %589 = vmatprep.subr.bf16.mxu0 %v789_v0 }
  0x75   :  { %572 = vmatpush3.bf16.msra.mxu1 %v621_v15 }
  0x76   :  { %573 = vmatprep.subr.bf16.mxu1 %v789_v0  ;;  %590 = vmatpush3.bf16.msra.mxu0 %v628_v22 }
  0x77   :  { %591 = vmatprep.subr.bf16.mxu0 %v789_v0 }
  0x79   :  { %574 = vmatpush3.bf16.msra.mxu1 %v622_v16 }
  0x7a   :  { %575 = vmatprep.subr.bf16.mxu1 %v789_v0  ;;  %592 = vmatpush3.bf16.msra.mxu0 %v629_v37 }
  0x7b   :  { %593 = vmatprep.subr.bf16.mxu0 %v789_v0 }
  0x7d   :  { %576 = vmatpush3.bf16.msra.mxu1 %v623_v17 }
  0x7e   :  { %594 = vmatpush3.bf16.msra.mxu0 %v630_v38 }
  0x7f   :  { %595 = vmatprep.subr.bf16.mxu0 %v789_v0 }
  0x82   :  { %596 = vmatpush3.bf16.msra.mxu0 %v631_v39 }
 0x133   :  { %v241_v24 = vpop.f32.mrb[0].mxu1 }
 0x134   :  { %v559_v26 = vpop.f32.mrb[1].mxu1 }
 0x135   :  { %v244_v29 = vpop.f32.mrb[2].mxu1 }
 0x136   :  { %v560_v31 = vpop.f32.mrb[3].mxu1 }
 0x137   :  { %v169_v25 = vpop.f32.mrb[0].mxu0 }
 0x138   :  { %v170_v27 = vadd.f32 %v500_v23, %v169_v25  ;;  %v553_v28 = vpop.f32.mrb[1].mxu0 }
 0x139   :  { %v172_v30 = vpop.f32.mrb[2].mxu0 }
 0x13a   :  { %v173_v32 = vadd.f32 %v500_v23, %v172_v30  ;;  %v554_v33 = vpop.f32.mrb[3].mxu0  ;;  %v176_v34 = vmax.f32 %v170_v27, 0.0 }
 0x13c   :  { %v177_v35 = vmax.f32 %v173_v32, 0.0 }
 0x13e   :  { %v178_v36 = vpack.c.bf16 %v177_v35, %v176_v34 }
 0x140   :  { %578 = vmatmul.mubr.bf16.vlgmr.msra.gmra.mrb[4].mxu1 %v178_v36 }
 0x213   :  { %v330_v40 = vpop.f32.mrb[4].mxu1 }
 0x214   :  { %v331_v42 = vadd.f32 %v330_v40, %v241_v24  ;;  %v579_v43 = vpop.f32.mrb[5].mxu1 }
 0x215   :  { %v333_v44 = vpop.f32.mrb[6].mxu1 }
 0x216   :  { %v344_v45 = vadd.f32 %v514_v41, %v331_v42  ;;  %v334_v46 = vadd.f32 %v333_v44, %v244_v29  ;;  %v580_v47 = vpop.f32.mrb[7].mxu1 }
 0x218   :  { %v345_v48 = vadd.f32 %v514_v41, %v334_v46  ;;  %v346_v49 = vmax.f32 %v344_v45, 0.0 }
 0x21a   :  { %v347_v50 = vmax.f32 %v345_v48, 0.0 }
 0x21c   :  { %v348_v51 = vpack.c.bf16 %v347_v50, %v346_v49 }
 0x21e   :  { %598 = vmatmul.mubr.bf16.vlgmr.msra.gmra.mrb[4].mxu0 %v348_v51 }
 0x2f1   :  { %v454_v53 = vpop.f32.mrb[4].mxu0 }
 0x2f2   :  { %v455_v54 = vadd.f32 %v515_v52, %v454_v53  ;;  %v599_v55 = vpop.f32.mrb[5].mxu0 }
 0x2f3   :  { %v457_v56 = vpop.f32.mrb[6].mxu0 }
 0x2f4   :  { %461 = vmax.xlane.f32.xlu0 %v455_v54  ;;  %v600_v57 = vpop.f32.mrb[7].mxu0  ;;  %v458_v58 = vadd.f32 %v515_v52, %v457_v56 }
 0x2f8   :  { %463 = vmax.xlane.f32.xlu0 %v458_v58 }
 0x381   :  { %v462_v59 = vpop.xlane.xlu0 %461 }
 0x382   :  { %v465_v60 = vsub.f32 %v455_v54, %v462_v59 }
 0x384   :  { %v467_v61 = vmul.f32 1.442695, %v465_v60 }
 0x385   :  { %v464_v62 = vpop.xlane.xlu0 %463 }
 0x386   :  { %632 = vpow2.f32 %v467_v61  ;;  %v466_v63 = vsub.f32 %v458_v58, %v464_v62 }
 0x388   :  { %v469_v0 = vmul.f32 1.442695, %v466_v63 }
 0x38a   :  { %634 = vpow2.f32 %v469_v0 }
 0x390   :  { %v633_v1 = vpop.eup %632 }
 0x391   :  { %471 = vadd.xlane.f32.xlu1 %v633_v1 }
 0x394   :  { %v635_v2 = vpop.eup %634 }
 0x395   :  { %473 = vadd.xlane.f32.xlu1 %v635_v2 }
 0x41e   :  { %v472_v3 = vpop.xlane.xlu1 %471 }
 0x41f   :  { %636 = vrcp.f32 %v472_v3 }
 0x422   :  { %v474_v4 = vpop.xlane.xlu1 %473 }
 0x423   :  { %638 = vrcp.f32 %v474_v4 }
 0x429   :  { %v637_v5 = vpop.eup %636 }
 0x42a   :  { %v476_v6 = vmul.f32 %v637_v5, %v633_v1 }
 0x42c   :  { %479 = vst [vmem:[#allocation11] sm:$0xff] %v476_v6 }
 0x42d   :  { %v639_v7 = vpop.eup %638 }
 0x42e   :  { %v478_v8 = vmul.f32 %v639_v7, %v635_v2 }
 0x430   :  { %480 = vst [vmem:[#allocation11 + $0x8] sm:$0xff] %v478_v8 }
 0x431   :  { %761 = shalt.err (!%p758_p2)
}
 0x432   :  { %s762_s18 = scalar_lea.hbm %s980_s9, 256 }
 0x433   :  { %p763_p3 = scmp.ne.s32.totalorder %s980_s9, %s762_s18  ;;  %p766_p4 = scmp.lt.u32.totalorder %s762_s18, %s980_s9 }
 0x435   :  { %p768_p5 = pnand %p766_p4, %p763_p3 }
 0x437   :  { %771 = shalt.err (!%p768_p5)
}
 0x438   :  { %492 = dma.vmem_to_hbm [thread:$0]  %s487_s8, 256, %s980_s9, [#allocation4], %s781_s19, %s781_s19, %s782_s20  }
 0x439   :  { %778 = dma.done.wait [#allocation4], 256  }
 0x43a   :  { %779 = vsyncadd [#allocation4], 4294967040 }
 0x43b   :  { %496 = vsyncpa [#allocation3], 1 }
 0x43c   :  { %497 = vsyncpa [#allocation6], 1 }
 0x43d   :  { %498 = vsyncpa [#allocation9], 1 }
 0x43e   :  { %499 = vsyncpa [#allocation4], 1 }

</bundles_post_ra>
